<compile_context>
chip_gen: v6e
topology: v6e:2x2x1
jax: 0.10.0
libtpu: 0.0.40
codegen_flags: <defaults>
</compile_context>

<pallas_src>
import functools

import numpy as np
import jax
import jax.numpy as jnp
from jax import lax
from jax.experimental import pallas as pl
from jax.experimental.pallas import tpu as pltpu

LANE = 128     # vreg lane width
SUBLANE = 8    # vreg sublane count (f32)


def _round_up(x, m):
    return (x + m - 1) // m * m


# ------------------------------ fused Pallas kernel ---------------------------

def _fused_kernel(grow_ref, x_ref, mask_ref, w_enc_ref, b_enc_ref,
                  w_proj_ref, b_proj_ref, o_ref):
    """Fused forward:
         h        = tanh(x @ W_enc + b_enc) * attention_mask      (stub encoder)
         pooled_r = mean_{t : grow[t] == r} h[t]                  (process_encoder_outputs)
         out      = pooled @ W_proj^T + b_proj                    (proj_layer)

    The intermediate h stays in VMEM/vregs (compiler managed) — it is never
    written back to HBM between the stages.  Matmul operands are bf16, all
    accumulation / tanh / mean math is f32.
    """
    n_tok = x_ref.shape[0]      # B*S tokens (sublane axis)
    r_pad = o_ref.shape[0]      # padded number of pooled word rows

    # --- stub encoder: bf16 MXU matmul, f32 accumulate + tanh + mask ---
    h = jnp.dot(x_ref[...], w_enc_ref[...], preferred_element_type=jnp.float32)
    h = jnp.tanh(h + b_enc_ref[...]) * mask_ref[...]
    h_bf = h.astype(jnp.bfloat16)                              # [n_tok, H_pad]

    # --- segment-mean pooling as an on-device one-hot matmul ---
    # grow[t] = global output row for token t, or -1 for ignored tokens.
    grow = jnp.broadcast_to(grow_ref[...], (r_pad, n_tok))     # [r_pad, n_tok] int32
    rows = lax.broadcasted_iota(jnp.int32, (r_pad, n_tok), 0)
    onehot = (rows == grow).astype(jnp.float32)                # [r_pad, n_tok]
    counts = jnp.sum(onehot, axis=1, keepdims=True)            # [r_pad, 1] (small ints)
    pooled = jnp.dot(onehot.astype(jnp.bfloat16), h_bf,
                     preferred_element_type=jnp.float32)       # [r_pad, H_pad]
    pooled = pooled / jnp.maximum(counts, 1.0)                 # exact segment mean

    # --- projection Linear (lane-dense [r_pad, 128] output slab) ---
    o_ref[...] = (
        jnp.dot(pooled.astype(jnp.bfloat16), w_proj_ref[...],
                preferred_element_type=jnp.float32)
        + b_proj_ref[...]
    )


def _fused_forward(grow, x_emb, mask2d, w_enc, b_enc, w_proj_t, b_proj, *, r_pad):
    n_tok, h_pad = x_emb.shape
    l_pad = w_proj_t.shape[1]

    flops = (2 * n_tok * h_pad * h_pad          # encoder matmul
             + 2 * r_pad * n_tok * h_pad        # pooling matmul
             + 2 * r_pad * h_pad * l_pad)       # projection matmul
    bytes_accessed = sum(int(np.prod(a.shape)) * a.dtype.itemsize
                         for a in (grow, x_emb, mask2d, w_enc, b_enc, w_proj_t, b_proj))
    bytes_accessed += r_pad * l_pad * 4

    vmem = pl.BlockSpec(memory_space=pltpu.MemorySpace.VMEM)
    return pl.pallas_call(
        _fused_kernel,
        out_shape=jax.ShapeDtypeStruct((r_pad, l_pad), jnp.float32),
        in_specs=[vmem] * 7,
        out_specs=vmem,
        cost_estimate=pl.CostEstimate(flops=flops,
                                      transcendentals=n_tok * h_pad,
                                      bytes_accessed=bytes_accessed),
    )(grow, x_emb, mask2d, w_enc, b_enc, w_proj_t, b_proj)


# ------------------------------ forward wrapper -------------------------------

@functools.partial(jax.jit, static_argnames=("num_rows", "num_labels"))
def pretrained_classifier_forward(params, input_ids, input_mask, example_mask,
                                  *, num_rows, num_labels):
    """End-to-end jittable forward.  `num_rows` (total word rows R) must be
    static because it defines the output shape."""
    B, S = input_ids.shape
    N = B * S
    H_pad = params["emb"].shape[1]
    r_pad = _round_up(max(num_rows, 1), SUBLANE)

    # glue: embedding gather for the stub encoder (bf16, lane-padded to 128)
    x_emb = params["emb"][input_ids.reshape(-1)]                           # [N, H_pad]
    mask2d = jnp.broadcast_to(
        input_mask.reshape(N, 1).astype(params["emb"].dtype), (N, H_pad))  # lane-dense

    # on-device token -> output-row map (replaces the host-built dense pool matrix)
    # NOTE: word indices in example_mask are assumed non-decreasing per example
    # (true for sub-word tokenization), so numeric order == appearance order.
    em = example_mask.astype(jnp.int32)                                    # [B, S]
    words_per_ex = jnp.maximum(jnp.max(em, axis=1) + 1, 0)                 # [B]
    offsets = jnp.concatenate(
        [jnp.zeros((1,), jnp.int32),
         jnp.cumsum(words_per_ex)[:-1].astype(jnp.int32)])                 # [B]
    grow = jnp.where(em >= 0, em + offsets[:, None], -1).reshape(1, N)
    grow = grow.astype(jnp.int32)                                          # [1, N]

    logits_pad = _fused_forward(grow, x_emb, mask2d,
                                params["w_enc"], params["b_enc"],
                                params["w_proj_t"], params["b_proj"],
                                r_pad=r_pad)                               # [r_pad, 128]
    return logits_pad[:num_rows, :num_labels]                              # [R, num_labels]


# ------------------------------------ main ------------------------------------

if __name__ == "__main__":
    B, S, H = 2, 16, 32
    VOCAB, NUM_LABELS = 50, 16
    H_PAD = _round_up(H, LANE)            # 128 — lane-dense hidden
    L_PAD = _round_up(NUM_LABELS, LANE)   # 128 — lane-dense logits slab

    key = jax.random.PRNGKey(0)
    k_emb, k_we, k_be, k_wp, k_bp, k_ids = jax.random.split(key, 6)

    emb = jax.random.normal(k_emb, (VOCAB, H), jnp.float32) * 0.1
    w_enc = jax.random.normal(k_we, (H, H), jnp.float32) * 0.1
    b_enc = jax.random.normal(k_be, (1, H), jnp.float32) * 0.1
    # torch Linear weight is [out_features, in_features]; kernel uses its transpose
    w_proj_t = jax.random.normal(k_wp, (H, NUM_LABELS), jnp.float32) * 0.1
    b_proj = jax.random.normal(k_bp, (1, NUM_LABELS), jnp.float32) * 0.1

    def pad2(a, r, c):
        return jnp.pad(a, ((0, r - a.shape[0]), (0, c - a.shape[1])))

    params = {
        # matmul operands in bf16 (MXU-native), biases in f32; lanes padded to 128
        "emb": pad2(emb, VOCAB, H_PAD).astype(jnp.bfloat16),
        "w_enc": pad2(w_enc, H_PAD, H_PAD).astype(jnp.bfloat16),
        "b_enc": pad2(b_enc, 1, H_PAD),
        "w_proj_t": pad2(w_proj_t, H_PAD, L_PAD).astype(jnp.bfloat16),
        "b_proj": pad2(b_proj, 1, L_PAD),
    }

    input_ids = jax.random.randint(k_ids, (B, S), 0, VOCAB, dtype=jnp.int32)

    # attention mask: last few tokens padded out
    input_mask_np = np.ones((B, S), dtype=np.float32)
    input_mask_np[0, 12:] = 0.0
    input_mask_np[1, 10:] = 0.0
    input_mask = jnp.asarray(input_mask_np)

    # example_mask: -1 = ignore (CLS / padding), else non-decreasing word index
    example_mask_np = -np.ones((B, S), dtype=np.int32)
    example_mask_np[0, 1:12] = np.array([0, 0, 1, 2, 2, 2, 3, 3, 4, 4, 4])
    example_mask_np[1, 1:10] = np.array([0, 1, 1, 2, 3, 3, 3, 4, 4])
    example_mask = jnp.asarray(example_mask_np)

    # static total row count R (defines the output shape; everything else on device)
    num_rows = int(sum(int(example_mask_np[b].max()) + 1
                       if (example_mask_np[b] >= 0).any() else 0
                       for b in range(B)))

    logits = pretrained_classifier_forward(
        params, input_ids, input_mask, example_mask,
        num_rows=num_rows, num_labels=NUM_LABELS)
    logits = jax.block_until_ready(logits)

    # --------------- pure-f32 numpy reference (module semantics) ---------------
    emb_np, w_enc_np, b_enc_np = np.asarray(emb), np.asarray(w_enc), np.asarray(b_enc)
    w_proj_np, b_proj_np = np.asarray(w_proj_t), np.asarray(b_proj)

    x = emb_np[np.asarray(input_ids).reshape(-1)]                      # [B*S, H]
    h_ref = np.tanh(x @ w_enc_np + b_enc_np) * input_mask_np.reshape(-1, 1)
    pooled_rows = []
    for b in range(B):
        em_b = example_mask_np[b]
        h_b = h_ref[b * S:(b + 1) * S]
        for w in sorted(set(int(v) for v in em_b if v >= 0)):
            pooled_rows.append(h_b[em_b == w].mean(axis=0))
    pooled_ref = np.stack(pooled_rows, axis=0)                         # [R, H]
    out_ref = pooled_ref @ w_proj_np + b_proj_np                       # [R, num_labels]

    assert logits.shape == out_ref.shape, (logits.shape, out_ref.shape)
    # tolerance accounts for bf16 matmul operands (f32 accumulation)
    np.testing.assert_allclose(np.asarray(logits), out_ref, rtol=5e-2, atol=5e-3)
    print("KERNEL_OK")
</pallas_src>

<mosaic_0001>
module attributes {stable_mosaic.version = 11 : i64} {
  func.func @_fused_kernel(%arg0: memref<1x32xi32, #tpu.memory_space<vmem>>, %arg1: memref<32x128xbf16, #tpu.memory_space<vmem>>, %arg2: memref<32x128xbf16, #tpu.memory_space<vmem>>, %arg3: memref<128x128xbf16, #tpu.memory_space<vmem>>, %arg4: memref<1x128xf32, #tpu.memory_space<vmem>>, %arg5: memref<128x128xbf16, #tpu.memory_space<vmem>>, %arg6: memref<1x128xf32, #tpu.memory_space<vmem>>, %arg7: memref<16x128xf32, #tpu.memory_space<vmem>>) attributes {dimension_semantics = [], scalar_prefetch = 0 : i64, scratch_operands = 0 : i64, tpu.core_type = #tpu.core_type<tc>} {
    %c0 = arith.constant 0 : index
    %c0_0 = arith.constant 0 : index
    %0 = vector.load %arg1[%c0, %c0_0] : memref<32x128xbf16, #tpu.memory_space<vmem>>, vector<32x128xbf16>
    %c0_1 = arith.constant 0 : index
    %c0_2 = arith.constant 0 : index
    %1 = vector.load %arg3[%c0_1, %c0_2] : memref<128x128xbf16, #tpu.memory_space<vmem>>, vector<128x128xbf16>
    %cst = arith.constant dense<0.000000e+00> : vector<32x128xf32>
    %2 = tpu.matmul %0, %1, %cst {dimension_numbers = #tpu.dot_dimension_numbers<[1], [0], [0], [1], [0, 0, 1, 1], [], []>} : vector<32x128xbf16>, vector<128x128xbf16>, vector<32x128xf32> -> vector<32x128xf32>
    %c0_3 = arith.constant 0 : index
    %c0_4 = arith.constant 0 : index
    %3 = vector.load %arg4[%c0_3, %c0_4] : memref<1x128xf32, #tpu.memory_space<vmem>>, vector<1x128xf32>
    %4 = vector.broadcast %3 : vector<1x128xf32> to vector<32x128xf32>
    %5 = arith.addf %2, %4 : vector<32x128xf32>
    %6 = math.tanh %5 : vector<32x128xf32>
    %c0_5 = arith.constant 0 : index
    %c0_6 = arith.constant 0 : index
    %7 = vector.load %arg2[%c0_5, %c0_6] : memref<32x128xbf16, #tpu.memory_space<vmem>>, vector<32x128xbf16>
    %8 = arith.extf %7 : vector<32x128xbf16> to vector<32x128xf32>
    %9 = arith.mulf %6, %8 : vector<32x128xf32>
    %10 = arith.truncf %9 : vector<32x128xf32> to vector<32x128xbf16>
    %c0_7 = arith.constant 0 : index
    %c0_8 = arith.constant 0 : index
    %11 = vector.load %arg0[%c0_7, %c0_8] : memref<1x32xi32, #tpu.memory_space<vmem>>, vector<1x32xi32>
    %12 = vector.shape_cast %11 : vector<1x32xi32> to vector<1x32xi32>
    %13 = vector.broadcast %12 : vector<1x32xi32> to vector<16x32xi32>
    %14 = tpu.iota {dimensions = array<i32: 0>} : vector<16x32xi32>
    %15 = arith.cmpi eq, %14, %13 : vector<16x32xi32>
    %16 = arith.extui %15 : vector<16x32xi1> to vector<16x32xi32>
    %17 = arith.sitofp %16 : vector<16x32xi32> to vector<16x32xf32>
    %cst_9 = arith.constant dense<0.000000e+00> : vector<16xf32>
    %18 = vector.multi_reduction <add>, %17, %cst_9 [1] : vector<16x32xf32> to vector<16xf32>
    %19 = vector.shape_cast %18 : vector<16xf32> to vector<16x1xf32>
    %20 = arith.truncf %17 : vector<16x32xf32> to vector<16x32xbf16>
    %cst_10 = arith.constant dense<0.000000e+00> : vector<16x128xf32>
    %21 = tpu.matmul %20, %10, %cst_10 {dimension_numbers = #tpu.dot_dimension_numbers<[1], [0], [0], [1], [0, 0, 1, 1], [], []>} : vector<16x32xbf16>, vector<32x128xbf16>, vector<16x128xf32> -> vector<16x128xf32>
    %cst_11 = arith.constant 1.000000e+00 : f32
    %22 = vector.broadcast %cst_11 : f32 to vector<16x1xf32>
    %23 = arith.maximumf %19, %22 : vector<16x1xf32>
    %24 = vector.broadcast %23 : vector<16x1xf32> to vector<16x128xf32>
    %25 = arith.divf %21, %24 : vector<16x128xf32>
    %26 = arith.truncf %25 : vector<16x128xf32> to vector<16x128xbf16>
    %c0_12 = arith.constant 0 : index
    %c0_13 = arith.constant 0 : index
    %27 = vector.load %arg5[%c0_12, %c0_13] : memref<128x128xbf16, #tpu.memory_space<vmem>>, vector<128x128xbf16>
    %cst_14 = arith.constant dense<0.000000e+00> : vector<16x128xf32>
    %28 = tpu.matmul %26, %27, %cst_14 {dimension_numbers = #tpu.dot_dimension_numbers<[1], [0], [0], [1], [0, 0, 1, 1], [], []>} : vector<16x128xbf16>, vector<128x128xbf16>, vector<16x128xf32> -> vector<16x128xf32>
    %c0_15 = arith.constant 0 : index
    %c0_16 = arith.constant 0 : index
    %29 = vector.load %arg6[%c0_15, %c0_16] : memref<1x128xf32, #tpu.memory_space<vmem>>, vector<1x128xf32>
    %30 = vector.broadcast %29 : vector<1x128xf32> to vector<16x128xf32>
    %31 = arith.addf %28, %30 : vector<16x128xf32>
    %c0_17 = arith.constant 0 : index
    %c0_18 = arith.constant 0 : index
    %32 = vector.load %arg7[%c0_17, %c0_18] : memref<16x128xf32, #tpu.memory_space<vmem>>, vector<16x128xf32>
    tpu.vector_store %arg7[%c0_17, %c0_18], %31 {strides = array<i32>} : memref<16x128xf32, #tpu.memory_space<vmem>>, vector<16x128xf32>,
    return
  }
}

</mosaic_0001>

<bundles_post_ra>
// kernel: pretrained_classifier_forward.1
= control target key start
LH: loop header
LB: loop body
LE: loop exit
PB: predicated region body
PF: predicated region fallthrough
CT: control target
= control target key end

     0   :  { %s681_s0 = inlined_call_operand.vmem [shape: s32[1,32], index: 0, kind: input, shape index: {}]   ;;  %s682_s1 = inlined_call_operand.vmem [shape: bf16[32,128], index: 1, kind: input, shape index: {}]   ;;  %s683_s2 = inlined_call_operand.vmem [shape: bf16[32,128], index: 2, kind: input, shape index: {}]   ;;  %s684_s3 = inlined_call_operand.vmem [shape: bf16[128,128], index: 3, kind: input, shape index: {}]   ;;  %s685_s4 = inlined_call_operand.vmem [shape: f32[1,128], index: 4, kind: input, shape index: {}]   ;;  %s686_s5 = inlined_call_operand.vmem [shape: bf16[128,128], index: 5, kind: input, shape index: {}]   ;;  %s687_s6 = inlined_call_operand.vmem [shape: f32[1,128], index: 6, kind: input, shape index: {}]   ;;  %s688_s7 = inlined_call_operand.hbm [shape: f32[16,128], index: 7, kind: output, shape index: {}]  }
   0x1   :  { %v493_v0 = vld [vmem:[%s684_s3 + $0x38] sm:$0xff]   ;;  %v494_v1 = vld [vmem:[%s684_s3 + $0x30] sm:$0xff]   ;;  %v495_v2 = vld [vmem:[%s684_s3 + $0x28] sm:$0xff]  }
   0x2   :  { %440 = vmatprep.subr.bf16.mxu0 %v493_v0  ;;  %v496_v3 = vld [vmem:[%s684_s3 + $0x20] sm:$0xff]   ;;  %v497_v5 = vld [vmem:[%s684_s3 + $0x18] sm:$0xff]  }
   0x3   :  { %441 = vmatpush3.bf16.msra.mxu0 %v493_v0  ;;  %v501_v4 = vld [vmem:[%s682_s1] sm:$0xff]  }
   0x4   :  { %442 = vmatprep.subr.bf16.mxu0 %v494_v1  ;;  %456 = vmatprep.mubr.bf16.mxu0 %v501_v4 }
   0x7   :  { %443 = vmatpush3.bf16.msra.mxu0 %v494_v1 }
   0x8   :  { %444 = vmatprep.subr.bf16.mxu0 %v495_v2 }
   0xb   :  { %445 = vmatpush3.bf16.msra.mxu0 %v495_v2 }
   0xc   :  { %446 = vmatprep.subr.bf16.mxu0 %v496_v3 }
   0xf   :  { %447 = vmatpush3.bf16.msra.mxu0 %v496_v3 }
  0x10   :  { %12 = vsyncpa [#allocation3], 0  ;;  %448 = vmatprep.subr.bf16.mxu0 %v497_v5  ;;  %v498_v6 = vld [vmem:[%s684_s3 + $0x10] sm:$0xff]   ;;  %v499_v7 = vld [vmem:[%s684_s3 + $0x8] sm:$0xff]   ;;  %v545_v10 = vmov 0.0   ;;  %v187_v11 = vlaneseq  ;;  %vm546_vm2 = vmmov 0  }
  0x11   :  { %v500_v8 = vld [vmem:[%s684_s3] sm:$0xff]   ;;  %v502_v9 = vld [vmem:[%s682_s1 + $0x8] sm:$0xff]   ;;  %460 = vmatprep.subr.bf16.mxu1 %v545_v10  ;;  %464 = vmatprep.mubr.msk.bf16.mxu1 %vm546_vm2, %v545_v10  ;;  %vm196_vm3 = vcmask 261120   ;;  %v503_v45 = vld [vmem:[%s686_s5 + $0x38] sm:$0xff]  }
  0x12   :  { %v188_v12 = vshrl.u32 %v187_v11, 7  ;;  %v396_v14 = vld [vmem:[%s681_s0] ss:$0 sm:$0xff]  ;;  %v417_v29 = vld [vmem:[%s683_s2 + $0x8] sm:$0xff]   ;;  %v504_v46 = vld [vmem:[%s686_s5 + $0x30] sm:$0xff]  }
  0x13   :  { %449 = vmatpush3.bf16.msra.mxu0 %v497_v5  ;;  %v385_v20 = vld [vmem:[%s685_s4] ss:$0 sm:$0xff]  ;;  %v415_v30 = vunpack.c.l.bf16 %v417_v29  ;;  %v416_v31 = vunpack.c.h.bf16 %v417_v29  ;;  %v505_v47 = vld [vmem:[%s686_s5 + $0x28] sm:$0xff]   ;;  %v507_v49 = vld [vmem:[%s686_s5 + $0x18] sm:$0xff]  }
  0x14   :  { %450 = vmatprep.subr.bf16.mxu0 %v498_v6  ;;  %v189_v13 = vadd.s32 8, %v188_v12  ;;  %vm190_vm0 = vcmp.eq.s32.totalorder %v188_v12, %v396_v14  ;;  %v410_v33 = vld [vmem:[%s683_s2] sm:$0xff]   ;;  %v508_v50 = vld [vmem:[%s686_s5 + $0x10] sm:$0xff]   ;;  %v509_v51 = vld [vmem:[%s686_s5 + $0x8] sm:$0xff]  }
  0x15   :  { %v397_v15 = vsel %vm190_vm0, 1.0, %v545_v10  ;;  %v412_v34 = vunpack.c.h.bf16 %v410_v33  ;;  %v411_v39 = vunpack.c.l.bf16 %v410_v33  ;;  %v506_v48 = vld [vmem:[%s686_s5 + $0x20] sm:$0xff]  }
  0x16   :  { %vm191_vm1 = vcmp.eq.s32.totalorder %v189_v13, %v396_v14  ;;  %v197_v18 = vsel %vm196_vm3, %v397_v15, 0.0  ;;  %v510_v52 = vld [vmem:[%s686_s5] sm:$0xff]   ;;  %s547_s5 = smov [#allocation2]  }
  0x17   :  { %451 = vmatpush3.bf16.msra.mxu0 %v498_v6  ;;  %v398_v16 = vsel %vm191_vm1, 1.0, %v545_v10  ;;  %198 = vadd.xlane.f32.xlu0 %v197_v18  ;;  %v400_v2 = vld [vmem:[%s687_s6] ss:$0 sm:$0xff]  ;;  %s374_s19 = sshll.u32 %s547_s5, 4  ;;  %s375_s19 = int_to_ptr.vmem [resolvable:$true] %s374_s19 }
  0x18   :  { %452 = vmatprep.subr.bf16.mxu0 %v499_v7  ;;  %v203_v17 = vpack.c.bf16 %v398_v16, %v397_v15  ;;  %v200_v19 = vsel %vm196_vm3, %v398_v16, 0.0  ;;  %s523_s20 = scalar_lea.vmem %s375_s19, 256  ;;  %p528_p1 = scmp.lt.s32.totalorder %s375_s19, %s375_s19 }
  0x19   :  { %p524_p0 = scmp.ne.s32.totalorder %s375_s19, %s523_s20  ;;  %p529_p2 = scmp.lt.s32.totalorder %s523_s20, %s523_s20 }
  0x1b   :  { %453 = vmatpush3.bf16.msra.mxu0 %v499_v7  ;;  %201 = vadd.xlane.f32.xlu0 %v200_v19  ;;  %p530_p3 = por %p529_p2, %p528_p1 }
  0x1c   :  { %454 = vmatprep.subr.bf16.mxu0 %v500_v8 }
  0x1d   :  { %p531_p4 = pnand %p530_p3, %p524_p0 }
  0x1f   :  { %455 = vmatpush3.bf16.msra.mxu0 %v500_v8 }
  0x22   :  { %457 = vmatmul.mubr.bf16.vlgmr.msra.gmra.mxu0 %v502_v9 }
  0xa0   :  { %v199_v53 = vpop.xlane.xlu0 %198 }
  0xa1   :  { %v248_v55 = vmax.f32 %v199_v53, 1.0 }
  0xa4   :  { %v202_v54 = vpop.xlane.xlu0 %201 }
  0xa5   :  { %v249_v56 = vmax.f32 %v202_v54, 1.0 }
  0xe2   :  { %v458_v21 = vpop.f32.mrf.mxu0 }
  0xe3   :  { %v158_v22 = vadd.f32 %v458_v21, %v385_v20 }
  0xe4   :  { %v149_v23 = vpop.f32.mrf.mxu0 }
  0xe5   :  { %v150_v24 = vadd.f32 %v385_v20, %v149_v23  ;;  %511 = vtanh.f32 %v158_v22 }
  0xe6   :  { %v459_v25 = vpop.f32.mrf.mxu0 }
  0xe7   :  { %v161_v26 = vadd.f32 %v459_v25, %v385_v20 }
  0xe8   :  { %v152_v27 = vpop.f32.mrf.mxu0 }
  0xe9   :  { %513 = vtanh.f32 %v161_v26  ;;  %v153_v28 = vadd.f32 %v385_v20, %v152_v27 }
  0xea   :  { %515 = vtanh.f32 %v150_v24 }
  0xeb   :  { %517 = vtanh.f32 %v153_v28 }
  0xec   :  { %519 = vrcp.f32 %v248_v55 }
  0xed   :  { %521 = vrcp.f32 %v249_v56 }
  0xf2   :  { %v512_v32 = vpop.eup %511 }
  0xf3   :  { %v178_v37 = vmul.f32 %v512_v32, %v415_v30 }
  0xf6   :  { %v514_v35 = vpop.eup %513 }
  0xf7   :  { %v516_v36 = vpop.eup %515  ;;  %v179_v38 = vmul.f32 %v514_v35, %v416_v31 }
  0xf8   :  { %v518_v40 = vpop.eup %517  ;;  %v176_v43 = vmul.f32 %v516_v36, %v411_v39 }
  0xf9   :  { %v181_v41 = vpack.c.bf16 %v179_v38, %v178_v37  ;;  %v177_v42 = vmul.f32 %v518_v40, %v412_v34  ;;  %v520_v58 = vpop.eup %519 }
  0xfa   :  { %v522_v59 = vpop.eup %521 }
  0xfb   :  { %461 = vmatpush3.bf16.msra.mxu1 %v181_v41  ;;  %v180_v44 = vpack.c.bf16 %v177_v42, %v176_v43 }
  0xfc   :  { %462 = vmatprep.subr.bf16.mxu1 %v545_v10 }
  0xff   :  { %463 = vmatpush3.bf16.msra.mxu1 %v180_v44 }
 0x100   :  { %468 = vmatprep.subr.bf16.mxu1 %v545_v10 }
 0x102   :  { %465 = vmatmul.mubr.msk.bf16.vlgmr.msra.gmra.mxu1 %vm196_vm3, %v203_v17 }
 0x103   :  { %469 = vmatpush3.bf16.msra.mxu1 %v503_v45  ;;  %484 = vmatprep.mubr.msk.bf16.mxu1 %vm546_vm2, %v545_v10 }
 0x104   :  { %470 = vmatprep.subr.bf16.mxu1 %v545_v10 }
 0x107   :  { %471 = vmatpush3.bf16.msra.mxu1 %v504_v46 }
 0x108   :  { %472 = vmatprep.subr.bf16.mxu1 %v545_v10 }
 0x10b   :  { %473 = vmatpush3.bf16.msra.mxu1 %v505_v47 }
 0x10c   :  { %474 = vmatprep.subr.bf16.mxu1 %v545_v10 }
 0x10f   :  { %475 = vmatpush3.bf16.msra.mxu1 %v506_v48 }
 0x110   :  { %476 = vmatprep.subr.bf16.mxu1 %v545_v10 }
 0x113   :  { %477 = vmatpush3.bf16.msra.mxu1 %v507_v49 }
 0x114   :  { %478 = vmatprep.subr.bf16.mxu1 %v545_v10 }
 0x117   :  { %479 = vmatpush3.bf16.msra.mxu1 %v508_v50 }
 0x118   :  { %480 = vmatprep.subr.bf16.mxu1 %v545_v10 }
 0x11b   :  { %481 = vmatpush3.bf16.msra.mxu1 %v509_v51 }
 0x11c   :  { %482 = vmatprep.subr.bf16.mxu1 %v545_v10 }
 0x11f   :  { %483 = vmatpush3.bf16.msra.mxu1 %v510_v52 }
 0x1c2   :  { %v241_v57 = vpop.f32.mrf.mxu1 }
 0x1c3   :  { %v251_v62 = vmul.f32 %v520_v58, %v241_v57 }
 0x1c4   :  { %v466_v60 = vpop.f32.mrf.mxu1 }
 0x1c6   :  { %v244_v61 = vpop.f32.mrf.mxu1 }
 0x1c7   :  { %v253_v63 = vmul.f32 %v522_v59, %v244_v61 }
 0x1c8   :  { %v467_v0 = vpop.f32.mrf.mxu1 }
 0x1c9   :  { %v254_v1 = vpack.c.bf16 %v253_v63, %v251_v62 }
 0x1cb   :  { %485 = vmatmul.mubr.bf16.vlgmr.msra.gmra.mxu1 %v254_v1 }
 0x28b   :  { %v360_v3 = vpop.f32.mrf.mxu1 }
 0x28c   :  { %v361_v4 = vadd.f32 %v400_v2, %v360_v3 }
 0x28d   :  { %v486_v5 = vpop.f32.mrf.mxu1 }
 0x28e   :  { %367 = vst [vmem:[#allocation2] sm:$0xff] %v361_v4 }
 0x28f   :  { %v363_v6 = vpop.f32.mrf.mxu1 }
 0x290   :  { %v364_v7 = vadd.f32 %v400_v2, %v363_v6 }
 0x291   :  { %v487_v8 = vpop.f32.mrf.mxu1 }
 0x292   :  { %368 = vst [vmem:[#allocation2 + $0x8] sm:$0xff] %v364_v7 }
 0x293   :  { %534 = shalt.err (!%p531_p4)
}
 0x294   :  { %s548_s21 = smov 128   ;;  %s549_s6 = smov 8  }
 0x295   :  { %380 = dma.vmem_to_hbm [thread:$0]  %s375_s19, 256, %s688_s7, [#allocation3], %s548_s21, %s548_s21, %s549_s6  }
 0x296   :  { %543 = dma.done.wait [#allocation3], 256  }
 0x297   :  { %544 = vsyncadd [#allocation3], 4294967040 }
 0x298   :  { %384 = vsyncpa [#allocation3], 1 }

</bundles_post_ra>
